<compile_context>
chip_gen: v7x
topology: tpu7x:2x2x1
jax: 0.10.0
libtpu: 0.0.40
codegen_flags: <defaults>
</compile_context>

<pallas_src>
import functools
import numpy as np
import jax
import jax.numpy as jnp
from jax.experimental import pallas as pl
from jax.experimental.pallas import tpu as pltpu


# ----------------------------------------------------------------------------
# Sedenion algebra (Cayley-Dickson construction) -- pure numpy, build-time only.
# ----------------------------------------------------------------------------
def _cd_conj(a):
    c = -a.copy()
    c[0] = a[0]
    return c


def _cd_mult(a, b):
    n = len(a)
    if n == 1:
        return np.array([a[0] * b[0]], dtype=np.float64)
    h = n // 2
    a1, a2 = a[:h], a[h:]
    b1, b2 = b[:h], b[h:]
    # (a1, a2)(b1, b2) = (a1 b1 - conj(b2) a2 , b2 a1 + a2 conj(b1))
    return np.concatenate([
        _cd_mult(a1, b1) - _cd_mult(_cd_conj(b2), a2),
        _cd_mult(b2, a1) + _cd_mult(a2, _cd_conj(b1)),
    ])


def sedenion_left_mult_matrices():
    """A_i[j, k] = coefficient of e_k in (e_i * e_j); so e_i * x == x @ A_i."""
    n = 16
    A = np.zeros((n, n, n), dtype=np.float64)
    eye = np.eye(n, dtype=np.float64)
    for i in range(n):
        for j in range(n):
            A[i, j, :] = _cd_mult(eye[i], eye[j])
    return A  # (16, 16, 16)


# ----------------------------------------------------------------------------
# Pallas kernel: SedenionLinear -> GELU(tanh) -> per-pixel proj Linear (+bias)
# ----------------------------------------------------------------------------
def _hyper_attn_kernel(x_ref, ws_ref, wp_ref, b_ref, o_ref, *, bf16_elementwise):
    gdim = wp_ref.shape[0]               # proj group width (Cp, or F for dense path)
    n_groups = o_ref.shape[1] // gdim    # 16 (block-diag) or 1 (dense kron)
    tm = x_ref.shape[0]

    x = x_ref[...]                                                    # (tm, F) bf16
    wp = wp_ref[...]                                                  # (gdim, gdim) bf16
    bias = jnp.broadcast_to(b_ref[...], (tm, gdim))                   # f32, hoisted

    # Chunk the output-feature axis per window slot: only (tm, gdim) intermediates
    # are live (16x less VMEM/vreg churn than a full (tm, F) f32 activation);
    # K of the first matmul stays F so MXU depth is unchanged.
    for g in range(n_groups):
        ws_g = ws_ref[:, g * gdim:(g + 1) * gdim]                     # static view
        y = jnp.dot(x, ws_g, preferred_element_type=jnp.float32)      # (tm, gdim) f32
        # tanh-approx GELU lowers to the EUP (its own VLIW slot); exact erf is a
        # long f32 VALU polynomial that becomes the binding slot at large Cp.
        # Deviation vs nn.GELU()'s erf form is ~1e-3, inside the bf16 tolerance.
        if bf16_elementwise:
            yb = jax.nn.gelu(y.astype(jnp.bfloat16), approximate=True)
        else:
            yb = jax.nn.gelu(y, approximate=True).astype(jnp.bfloat16)
        z = jnp.dot(yb, wp, preferred_element_type=jnp.float32) + bias
        o_ref[:, g * gdim:(g + 1) * gdim] = z.astype(o_ref.dtype)


# ----------------------------------------------------------------------------
# Sizing helpers (generation-aware).
# ----------------------------------------------------------------------------
def _round_up(x, m):
    return ((x + m - 1) // m) * m


def _vmem_budget_bytes():
    """~3/4 of physical VMEM: ~96 MiB on v5e/v6e (128 MiB), ~48 MiB on v7x (64 MiB)."""
    try:
        cap = int(pltpu.get_tpu_info().vmem_capacity_bytes)
    except Exception:
        cap = 64 << 20
    return max(32 << 20, (cap * 3) // 4)


def _bf16_elementwise_ok():
    """v6e/v7x have bf16 VALU/EUP paths; v5e and older do not -> keep f32 there."""
    try:
        kind = jax.devices()[0].device_kind.lower()
    except Exception:
        return False
    return not any(old in kind for old in ("v2", "v3", "v4", "v5"))


def _vmem_bytes(tm, f, gdim):
    # Streaming tiles (double-buffered), resident weights (single-buffered) and
    # the in-kernel per-chunk intermediates (f32 act + bf16 copy + f32 proj).
    return (2 * tm * f * 2          # bf16 input tile
            + 2 * tm * f * 2        # bf16 output tile
            + f * f * 2             # bf16 sedenion weight (resident)
            + gdim * gdim * 2       # bf16 proj weight
            + gdim * 4              # f32 bias row
            + tm * gdim * 10)       # chunk intermediates


def _pick_tile(n, f, gdim, tm_target):
    """Pad N only to a 128 multiple; pick the largest 128-multiple tile that
    divides it, fits the VMEM budget, and leaves >= ~8 grid steps (megacore)."""
    n128 = _round_up(max(n, 128), 128)
    m = n128 // 128
    budget = _vmem_budget_bytes()
    tm_cap = min(tm_target, max(128, _round_up(-(-n128 // 8), 128)))
    tm = 128
    for d in range(1, m + 1):
        cand = 128 * d
        if m % d == 0 and cand <= tm_cap and _vmem_bytes(cand, f, gdim) <= budget:
            tm = cand
    return n128, tm


def _resident_spec(shape):
    """Constant-index weight spec; single-buffer it (second pipeline buffer is waste)."""
    try:
        return pl.BlockSpec(shape, lambda i: (0, 0), pipeline_mode=pl.Buffered(1))
    except (TypeError, AttributeError):
        # Older jax without pipeline_mode/Buffered: fall back to default buffering.
        return pl.BlockSpec(shape, lambda i: (0, 0))


# ----------------------------------------------------------------------------
# pallas_call wrapper.
# ----------------------------------------------------------------------------
def hyper_attention_windowed(xw, w_sed, wp, bias, *, tm):
    """xw: (N, F) bf16 windowed input, N multiple of tm.  Returns (N, F) bf16."""
    n, f = xw.shape
    gdim = wp.shape[0]
    assert n % tm == 0 and f % gdim == 0

    cost = pl.CostEstimate(
        flops=2 * n * f * f + 2 * n * f * gdim,      # gdim == f on the dense-kron path
        transcendentals=n * f,                       # one tanh per element
        bytes_accessed=n * f * (2 + 2) + f * f * 2 + gdim * gdim * 2 + gdim * 4,
    )
    vmem_limit = int(min(_vmem_budget_bytes(), 112 << 20))

    kernel = functools.partial(_hyper_attn_kernel,
                               bf16_elementwise=_bf16_elementwise_ok())

    return pl.pallas_call(
        kernel,
        out_shape=jax.ShapeDtypeStruct((n, f), jnp.bfloat16),
        grid_spec=pltpu.PrefetchScalarGridSpec(
            num_scalar_prefetch=0,
            grid=(n // tm,),
            in_specs=[
                pl.BlockSpec((tm, f), lambda i: (i, 0)),
                _resident_spec((f, f)),          # W_sed, resident, single-buffered
                _resident_spec((gdim, gdim)),    # Wp
                _resident_spec((1, gdim)),       # bias
            ],
            out_specs=pl.BlockSpec((tm, f), lambda i: (i, 0)),
        ),
        compiler_params=pltpu.CompilerParams(
            # Row tiles are fully independent -> shard across TensorCores (v7x).
            dimension_semantics=("parallel",),
            vmem_limit_bytes=vmem_limit,
        ),
        cost_estimate=cost,
    )(xw, w_sed, wp, bias)


# ----------------------------------------------------------------------------
# Glue: window fold/unfold (pure layout) + parameter construction.
# ----------------------------------------------------------------------------
def get_window(x, window_size):
    # 'b c (h s1) (w s2) -> b h w (s1 s2 c)'
    B, C, H, W = x.shape
    s = window_size
    x = x.reshape(B, C, H // s, s, W // s, s)
    x = jnp.transpose(x, (0, 2, 4, 3, 5, 1))          # b h w s1 s2 c
    return x.reshape(B, H // s, W // s, s * s * C)


def reverse_window(x, window_size, C):
    # 'b h w (s1 s2 c) -> b c (h s1) (w s2)'
    B, Hn, Wn, F = x.shape
    s = window_size
    x = x.reshape(B, Hn, Wn, s, s, C)
    x = jnp.transpose(x, (0, 5, 1, 3, 2, 4))          # b c h s1 w s2
    return x.reshape(B, C, Hn * s, Wn * s)


def make_params(dim, key):
    """Deterministic synthetic logical parameters for HyperAttention(dim), f32."""
    k1, k2, k3 = jax.random.split(key, 3)
    S = jax.random.normal(k1, (16, dim, dim), dtype=jnp.float32) * 0.02   # SedenionLinear blocks
    Wp = jax.random.normal(k2, (dim, dim), dtype=jnp.float32) * 0.02       # proj weight (x @ Wp)
    bp = jax.random.normal(k3, (dim,), dtype=jnp.float32) * 0.02           # proj bias
    return S, Wp, bp


def prepare_kernel_params(params, dim):
    """Pad channels dim -> Cp (mult of 8) and build bf16 kernel weights."""
    S, Wp, bp = params
    cp = _round_up(max(dim, 8), 8)            # 16*cp is then a multiple of 128 lanes
    f = 16 * cp
    A = jnp.asarray(sedenion_left_mult_matrices(), dtype=jnp.float32)      # (16,16,16)
    S_pad = jnp.zeros((16, cp, cp), jnp.float32).at[:, :dim, :dim].set(S)
    # W_sed = sum_i kron(A_i, S_i); the layer computes x @ W_sed on the windowed axis.
    w_sed = jnp.einsum('ijk,icd->jckd', A, S_pad).reshape(f, f)
    wp_pad = jnp.zeros((cp, cp), jnp.float32).at[:dim, :dim].set(Wp)
    bias_pad = jnp.zeros((cp,), jnp.float32).at[:dim].set(bp)
    if cp % 128 == 0:
        # Lane-aligned channel groups: true (Cp, Cp) proj, applied block-diagonally
        # over 16 slots in-kernel (16x fewer proj FLOPs, Cp^2 resident weight).
        wp_kernel = wp_pad
        bias_kernel = bias_pad[None, :]
    else:
        # Small channel count: dense kron(I16, Wp) is cheaper than sub-vreg slicing.
        wp_kernel = jnp.kron(jnp.eye(16, dtype=jnp.float32), wp_pad)        # (f, f)
        bias_kernel = jnp.tile(bias_pad, 16)[None, :]                       # (1, f)
    return w_sed.astype(jnp.bfloat16), wp_kernel.astype(jnp.bfloat16), bias_kernel


def hyper_attention_forward(x, kernel_params, *, tm_target=512):
    """x: (B, C, H, W) float32 -> (B, C, H, W) float32."""
    w_sed, wp, bias = kernel_params
    B, C, H, W = x.shape
    f = w_sed.shape[0]
    cp = f // 16

    # Zero-pad channels so the windowed feature axis is lane dense (F % 128 == 0).
    if cp != C:
        x = jnp.pad(x, ((0, 0), (0, cp - C), (0, 0), (0, 0)))

    xw = get_window(x, 4)                               # (B, H/4, W/4, F)
    hn, wn = xw.shape[1], xw.shape[2]
    n = B * hn * wn
    xw2 = xw.reshape(n, f).astype(jnp.bfloat16)

    gdim = wp.shape[0]
    n_pad, tm = _pick_tile(n, f, gdim, tm_target)
    if n_pad != n:
        xw2 = jnp.pad(xw2, ((0, n_pad - n), (0, 0)))

    yw2 = hyper_attention_windowed(xw2, w_sed, wp, bias, tm=tm)   # bf16
    yw = yw2[:n].reshape(B, hn, wn, f)
    y = reverse_window(yw, 4, cp)                       # (B, Cp, H, W) bf16
    return y[:, :C].astype(jnp.float32)


def reference_forward(x, params):
    """Pure-JAX f32 reference mirroring the PyTorch forward (no padding/tiling)."""
    S, Wp, bp = params
    B, C, H, W = x.shape
    A = jnp.asarray(sedenion_left_mult_matrices(), dtype=jnp.float32)
    w_sed = jnp.einsum('ijk,icd->jckd', A, S).reshape(16 * C, 16 * C)
    xw = get_window(x, 4)
    xw = xw @ w_sed                                     # SedenionLinear (bias=False)
    y = reverse_window(xw, 4, C)                        # b c h w
    y = jnp.transpose(y, (0, 2, 3, 1))                  # b h w c
    y = jax.nn.gelu(y, approximate=False)               # nn.GELU() default (exact erf)
    y = y @ Wp + bp                                     # proj
    return jnp.transpose(y, (0, 3, 1, 2))               # b c h w


if __name__ == "__main__":
    key = jax.random.PRNGKey(0)
    kx, kp = jax.random.split(key)

    B, C, H, W = 2, 4, 16, 16                           # dim = 4, hidden = 64
    x = jax.random.normal(kx, (B, C, H, W), dtype=jnp.float32)

    params = make_params(C, kp)                         # logical f32 params
    kparams = prepare_kernel_params(params, C)          # padded / bf16 kernel weights

    fwd = jax.jit(hyper_attention_forward)
    out = jax.block_until_ready(fwd(x, kparams))

    assert out.shape == (B, C, H, W)
    assert bool(jnp.all(jnp.isfinite(out)))

    # Cross-check against the pure-JAX f32 reference.
    # Tolerance intentionally loose: bf16 matmuls/weights, bf16 output and the
    # tanh-approx GELU all deviate slightly from the f32 erf-GELU PyTorch path.
    ref = reference_forward(x, params)
    max_err = float(jnp.max(jnp.abs(out - ref)))
    assert max_err < 2e-2, f"kernel vs reference max abs err {max_err}"

    print("KERNEL_OK")
</pallas_src>

<mosaic_0001>
module attributes {stable_mosaic.version = 11 : i64} {
  func.func @_hyper_attn_kernel(%arg0: i32, %arg1: memref<128x128xbf16, #tpu.memory_space<vmem>>, %arg2: memref<128x128xbf16, #tpu.memory_space<vmem>>, %arg3: memref<128x128xbf16, #tpu.memory_space<vmem>>, %arg4: memref<1x128xf32, #tpu.memory_space<vmem>>, %arg5: memref<128x128xbf16, #tpu.memory_space<vmem>>) attributes {dimension_semantics = [#tpu.dimension_semantics<parallel>], iteration_bounds = array<i64: 1>, scalar_prefetch = 0 : i64, scratch_operands = 0 : i64, tpu.core_type = #tpu.core_type<tc>, window_params = [{transform_indices = @transform_0, window_bounds = array<i64: 128, 128>}, {pipeline_mode = #tpu.pipeline_mode<synchronous>, transform_indices = @transform_1, window_bounds = array<i64: 128, 128>}, {pipeline_mode = #tpu.pipeline_mode<synchronous>, transform_indices = @transform_2, window_bounds = array<i64: 128, 128>}, {pipeline_mode = #tpu.pipeline_mode<synchronous>, transform_indices = @transform_3, window_bounds = array<i64: 1, 128>}, {transform_indices = @transform_4, window_bounds = array<i64: 128, 128>}]} {
    %c0 = arith.constant 0 : index
    %c0_0 = arith.constant 0 : index
    %0 = vector.load %arg1[%c0, %c0_0] : memref<128x128xbf16, #tpu.memory_space<vmem>>, vector<128x128xbf16>
    %c0_1 = arith.constant 0 : index
    %c0_2 = arith.constant 0 : index
    %1 = vector.load %arg3[%c0_1, %c0_2] : memref<128x128xbf16, #tpu.memory_space<vmem>>, vector<128x128xbf16>
    %c0_3 = arith.constant 0 : index
    %c0_4 = arith.constant 0 : index
    %2 = vector.load %arg4[%c0_3, %c0_4] : memref<1x128xf32, #tpu.memory_space<vmem>>, vector<1x128xf32>
    %3 = vector.shape_cast %2 : vector<1x128xf32> to vector<1x128xf32>
    %4 = vector.broadcast %3 : vector<1x128xf32> to vector<128x128xf32>
    %c0_5 = arith.constant 0 : index
    %c0_6 = arith.constant 0 : index
    %5 = vector.load %arg2[%c0_5, %c0_6] : memref<128x128xbf16, #tpu.memory_space<vmem>>, vector<128x128xbf16>
    %cst = arith.constant dense<0.000000e+00> : vector<128x128xf32>
    %6 = tpu.matmul %0, %5, %cst {dimension_numbers = #tpu.dot_dimension_numbers<[1], [0], [0], [1], [0, 0, 1, 1], [], []>} : vector<128x128xbf16>, vector<128x128xbf16>, vector<128x128xf32> -> vector<128x128xf32>
    %7 = arith.truncf %6 : vector<128x128xf32> to vector<128x128xbf16>
    %8 = arith.mulf %7, %7 : vector<128x128xbf16>
    %9 = arith.mulf %7, %8 : vector<128x128xbf16>
    %cst_7 = arith.constant 4.467770e-02 : bf16
    %10 = vector.broadcast %cst_7 : bf16 to vector<128x128xbf16>
    %11 = arith.mulf %10, %9 : vector<128x128xbf16>
    %12 = arith.addf %7, %11 : vector<128x128xbf16>
    %cst_8 = arith.constant 7.968750e-01 : bf16
    %13 = vector.broadcast %cst_8 : bf16 to vector<128x128xbf16>
    %14 = arith.mulf %13, %12 : vector<128x128xbf16>
    %15 = math.tanh %14 : vector<128x128xbf16>
    %cst_9 = arith.constant 1.000000e+00 : bf16
    %16 = vector.broadcast %cst_9 : bf16 to vector<128x128xbf16>
    %17 = arith.addf %16, %15 : vector<128x128xbf16>
    %cst_10 = arith.constant 5.000000e-01 : bf16
    %18 = vector.broadcast %cst_10 : bf16 to vector<128x128xbf16>
    %19 = arith.mulf %18, %17 : vector<128x128xbf16>
    %20 = arith.mulf %7, %19 : vector<128x128xbf16>
    %cst_11 = arith.constant dense<0.000000e+00> : vector<128x128xf32>
    %21 = tpu.matmul %20, %1, %cst_11 {dimension_numbers = #tpu.dot_dimension_numbers<[1], [0], [0], [1], [0, 0, 1, 1], [], []>} : vector<128x128xbf16>, vector<128x128xbf16>, vector<128x128xf32> -> vector<128x128xf32>
    %22 = arith.addf %21, %4 : vector<128x128xf32>
    %23 = arith.truncf %22 : vector<128x128xf32> to vector<128x128xbf16>
    %c0_12 = arith.constant 0 : index
    %c0_13 = arith.constant 0 : index
    %24 = vector.load %arg5[%c0_12, %c0_13] : memref<128x128xbf16, #tpu.memory_space<vmem>>, vector<128x128xbf16>
    tpu.vector_store %arg5[%c0_12, %c0_13], %23 {strides = array<i32>} : memref<128x128xbf16, #tpu.memory_space<vmem>>, vector<128x128xbf16>,
    return
  }
  func.func @transform_0(%arg0: i32) -> (i32, i32) {
    %c0_i32 = arith.constant 0 : i32
    %c0_i32_0 = arith.constant 0 : i32
    return %arg0, %c0_i32 : i32, i32
  }
  func.func @transform_1(%arg0: i32) -> (i32, i32) {
    %c0_i32 = arith.constant 0 : i32
    %c0_i32_0 = arith.constant 0 : i32
    %c0_i32_1 = arith.constant 0 : i32
    return %c0_i32, %c0_i32_0 : i32, i32
  }
  func.func @transform_2(%arg0: i32) -> (i32, i32) {
    %c0_i32 = arith.constant 0 : i32
    %c0_i32_0 = arith.constant 0 : i32
    %c0_i32_1 = arith.constant 0 : i32
    return %c0_i32, %c0_i32_0 : i32, i32
  }
  func.func @transform_3(%arg0: i32) -> (i32, i32) {
    %c0_i32 = arith.constant 0 : i32
    %c0_i32_0 = arith.constant 0 : i32
    %c0_i32_1 = arith.constant 0 : i32
    return %c0_i32, %c0_i32_0 : i32, i32
  }
  func.func @transform_4(%arg0: i32) -> (i32, i32) {
    %c0_i32 = arith.constant 0 : i32
    %c0_i32_0 = arith.constant 0 : i32
    return %arg0, %c0_i32 : i32, i32
  }
}

</mosaic_0001>

<bundles_post_ra>
// kernel: hyper_attention_forward.1
= control target key start
LH: loop header
LB: loop body
LE: loop exit
PB: predicated region body
PF: predicated region fallthrough
CT: control target
= control target key end

     0   :  { %s985_s1 = inlined_call_operand.vmem [shape: bf16[128,128], index: 1, kind: input, shape index: {}]   ;;  %s986_s0 = inlined_call_operand.vmem [shape: bf16[128,128], index: 0, kind: input, shape index: {}]   ;;  %s987_s2 = inlined_call_operand.vmem [shape: bf16[128,128], index: 2, kind: input, shape index: {}]   ;;  %s988_s3 = inlined_call_operand.vmem [shape: f32[1,128], index: 3, kind: input, shape index: {}]   ;;  %s989_s4 = inlined_call_operand.vmem [shape: bf16[128,128], index: 4, kind: output, shape index: {}]  }
   0x1   :  { %v779_v0 = vld [vmem:[%s985_s1] sm:$0xff]   ;;  %v780_v1 = vld [vmem:[%s985_s1 + $0x8] sm:$0xff]   ;;  %v781_v2 = vld [vmem:[%s985_s1 + $0x10] sm:$0xff]  }
   0x2   :  { %715 = vmatprep.subr.bf16.mxu0 %v779_v0  ;;  %v782_v3 = vld [vmem:[%s985_s1 + $0x18] sm:$0xff]   ;;  %v787_v4 = vld [vmem:[%s986_s0] sm:$0xff]   ;;  %v784_v6 = vld [vmem:[%s985_s1 + $0x28] sm:$0xff]  }
   0x3   :  { %716 = vmatpush3.bf16.msra.mxu0 %v779_v0  ;;  %731 = vmatprep.mubr.bf16.mxu0 %v787_v4  ;;  %v783_v5 = vld [vmem:[%s985_s1 + $0x20] sm:$0xff]   ;;  %v785_v7 = vld [vmem:[%s985_s1 + $0x30] sm:$0xff]   ;;  %v786_v8 = vld [vmem:[%s985_s1 + $0x38] sm:$0xff]  }
   0x4   :  { %717 = vmatprep.subr.bf16.mxu0 %v780_v1  ;;  %v788_v9 = vld [vmem:[%s986_s0 + $0x8] sm:$0xff]   ;;  %v789_v10 = vld [vmem:[%s986_s0 + $0x10] sm:$0xff]   ;;  %v790_v11 = vld [vmem:[%s986_s0 + $0x18] sm:$0xff]  }
   0x5   :  { %v791_v12 = vld [vmem:[%s986_s0 + $0x20] sm:$0xff]   ;;  %v792_v13 = vld [vmem:[%s986_s0 + $0x28] sm:$0xff]   ;;  %v793_v14 = vld [vmem:[%s986_s0 + $0x30] sm:$0xff]  }
   0x6   :  { %v794_v15 = vld [vmem:[%s986_s0 + $0x38] sm:$0xff]   ;;  %v795_v16 = vld [vmem:[%s987_s2] sm:$0xff]   ;;  %v796_v17 = vld [vmem:[%s987_s2 + $0x8] sm:$0xff]  }
   0x7   :  { %718 = vmatpush3.bf16.msra.mxu0 %v780_v1  ;;  %747 = vmatprep.subr.bf16.mxu1 %v795_v16  ;;  %v797_v18 = vld [vmem:[%s987_s2 + $0x10] sm:$0xff]   ;;  %v798_v19 = vld [vmem:[%s987_s2 + $0x18] sm:$0xff]   ;;  %v799_v20 = vld [vmem:[%s987_s2 + $0x20] sm:$0xff]  }
   0x8   :  { %719 = vmatprep.subr.bf16.mxu0 %v781_v2  ;;  %748 = vmatpush3.bf16.msra.mxu1 %v795_v16  ;;  %v800_v21 = vld [vmem:[%s987_s2 + $0x28] sm:$0xff]   ;;  %v801_v22 = vld [vmem:[%s987_s2 + $0x30] sm:$0xff]   ;;  %v802_v23 = vld [vmem:[%s987_s2 + $0x38] sm:$0xff]  }
   0x9   :  { %749 = vmatprep.subr.bf16.mxu1 %v796_v17 }
   0xb   :  { %720 = vmatpush3.bf16.msra.mxu0 %v781_v2 }
   0xc   :  { %721 = vmatprep.subr.bf16.mxu0 %v782_v3  ;;  %750 = vmatpush3.bf16.msra.mxu1 %v796_v17 }
   0xd   :  { %751 = vmatprep.subr.bf16.mxu1 %v797_v18 }
   0xf   :  { %722 = vmatpush3.bf16.msra.mxu0 %v782_v3 }
  0x10   :  { %723 = vmatprep.subr.bf16.mxu0 %v783_v5  ;;  %752 = vmatpush3.bf16.msra.mxu1 %v797_v18 }
  0x11   :  { %753 = vmatprep.subr.bf16.mxu1 %v798_v19 }
  0x13   :  { %724 = vmatpush3.bf16.msra.mxu0 %v783_v5 }
  0x14   :  { %725 = vmatprep.subr.bf16.mxu0 %v784_v6  ;;  %754 = vmatpush3.bf16.msra.mxu1 %v798_v19 }
  0x15   :  { %755 = vmatprep.subr.bf16.mxu1 %v799_v20 }
  0x17   :  { %726 = vmatpush3.bf16.msra.mxu0 %v784_v6 }
  0x18   :  { %727 = vmatprep.subr.bf16.mxu0 %v785_v7  ;;  %756 = vmatpush3.bf16.msra.mxu1 %v799_v20 }
  0x19   :  { %757 = vmatprep.subr.bf16.mxu1 %v800_v21 }
  0x1b   :  { %728 = vmatpush3.bf16.msra.mxu0 %v785_v7 }
  0x1c   :  { %729 = vmatprep.subr.bf16.mxu0 %v786_v8  ;;  %758 = vmatpush3.bf16.msra.mxu1 %v800_v21 }
  0x1d   :  { %759 = vmatprep.subr.bf16.mxu1 %v801_v22 }
  0x1f   :  { %730 = vmatpush3.bf16.msra.mxu0 %v786_v8 }
  0x20   :  { %760 = vmatpush3.bf16.msra.mxu1 %v801_v22 }
  0x21   :  { %761 = vmatprep.subr.bf16.mxu1 %v802_v23 }
  0x22   :  { %732 = vmatmul.mubr.bf16.vlgmr.msra.gmra.mrb[0].mxu0 %v788_v9 }
  0x23   :  { %735 = vmatprep.mubr.bf16.mxu0 %v789_v10 }
  0x24   :  { %762 = vmatpush3.bf16.msra.mxu1 %v802_v23 }
  0x2a   :  { %736 = vmatmul.mubr.bf16.gmra.mrb[4].mxu0 %v790_v11 }
  0x2b   :  { %739 = vmatprep.mubr.bf16.mxu0 %v791_v12 }
  0x32   :  { %740 = vmatmul.mubr.bf16.gmra.mrb[8].mxu0 %v792_v13 }
  0x33   :  { %743 = vmatprep.mubr.bf16.mxu0 %v793_v14 }
  0x3a   :  { %744 = vmatmul.mubr.bf16.gmra.mrb[12].mxu0 %v794_v15 }
  0xf5   :  { %v733_v24 = vpop.f32.mrb[0].mxu0 }
  0xf6   :  { %v207_v25 = vpop.f32.mrb[1].mxu0 }
  0xf7   :  { %v734_v26 = vpop.f32.mrb[2].mxu0 }
  0xf8   :  { %v916_v27 = vpack.c.bf16 %v734_v26, %v733_v24  ;;  %v210_v28 = vpop.f32.mrb[3].mxu0 }
  0xf9   :  { %v918_v29 = vpack.c.bf16 %v210_v28, %v207_v25 }
  0xfa   :  { %v279_v30 = vmul.bf16 %v916_v27, %v916_v27 }
  0xfb   :  { %v278_v31 = vmul.bf16 %v918_v29, %v918_v29 }
  0xfc   :  { %v287_v32 = vmul.bf16 %v279_v30, %v916_v27 }
  0xfd   :  { %v286_v33 = vmul.bf16 %v278_v31, %v918_v29  ;;  %v737_v34 = vpop.f32.mrb[4].mxu0 }
  0xfe   :  { %v295_v35 = vmul.bf16 1027030327, %v287_v32  ;;  %v223_v36 = vpop.f32.mrb[5].mxu0 }
  0xff   :  { %v738_v37 = vpop.f32.mrb[6].mxu0  ;;  %v294_v38 = vmul.bf16 1027030327, %v286_v33 }
 0x100   :  { %v303_v39 = vadd.bf16 %v295_v35, %v916_v27  ;;  %v927_v40 = vpack.c.bf16 %v738_v37, %v737_v34  ;;  %v226_v41 = vpop.f32.mrb[7].mxu0 }
 0x101   :  { %v929_v42 = vpack.c.bf16 %v226_v41, %v223_v36  ;;  %v302_v43 = vadd.bf16 %v294_v38, %v918_v29 }
 0x102   :  { %v311_v44 = vmul.bf16 1061961548, %v303_v39  ;;  %v281_v45 = vmul.bf16 %v927_v40, %v927_v40 }
 0x103   :  { %v280_v46 = vmul.bf16 %v929_v42, %v929_v42  ;;  %v310_v47 = vmul.bf16 1061961548, %v302_v43 }
 0x104   :  { %v289_v48 = vmul.bf16 %v281_v45, %v927_v40  ;;  %803 = vtanh.bf16 %v311_v44 }
 0x105   :  { %v288_v49 = vmul.bf16 %v280_v46, %v929_v42  ;;  %v741_v50 = vpop.f32.mrb[8].mxu0  ;;  %805 = vtanh.bf16 %v310_v47 }
 0x106   :  { %v297_v51 = vmul.bf16 1027030327, %v289_v48  ;;  %v239_v52 = vpop.f32.mrb[9].mxu0 }
 0x107   :  { %v296_v53 = vmul.bf16 1027030327, %v288_v49  ;;  %v742_v54 = vpop.f32.mrb[10].mxu0 }
 0x108   :  { %v305_v55 = vadd.bf16 %v297_v51, %v927_v40  ;;  %v939_v56 = vpack.c.bf16 %v742_v54, %v741_v50  ;;  %v242_v57 = vpop.f32.mrb[11].mxu0 }
 0x109   :  { %v304_v58 = vadd.bf16 %v296_v53, %v929_v42  ;;  %v942_v59 = vpack.c.bf16 %v242_v57, %v239_v52 }
 0x10a   :  { %v313_v60 = vmul.bf16 1061961548, %v305_v55  ;;  %v283_v61 = vmul.bf16 %v939_v56, %v939_v56 }
 0x10b   :  { %v312_v62 = vmul.bf16 1061961548, %v304_v58  ;;  %v282_v63 = vmul.bf16 %v942_v59, %v942_v59  ;;  %v579_v58 = vld [vmem:[%s988_s3] ss:$0 sm:$0xff] }
 0x10c   :  { %v291_v0 = vmul.bf16 %v283_v61, %v939_v56  ;;  %807 = vtanh.bf16 %v313_v60 }
 0x10d   :  { %v290_v1 = vmul.bf16 %v282_v63, %v942_v59  ;;  %v745_v2 = vpop.f32.mrb[12].mxu0  ;;  %809 = vtanh.bf16 %v312_v62 }
 0x10e   :  { %v299_v3 = vmul.bf16 1027030327, %v291_v0  ;;  %v255_v4 = vpop.f32.mrb[13].mxu0 }
 0x10f   :  { %v804_v5 = vpop.eup %803  ;;  %v298_v6 = vmul.bf16 1027030327, %v290_v1  ;;  %v746_v7 = vpop.f32.mrb[14].mxu0 }
 0x110   :  { %v806_v8 = vpop.eup %805  ;;  %v307_v9 = vadd.bf16 %v299_v3, %v939_v56  ;;  %v277_v10 = vpack.c.bf16 %v746_v7, %v745_v2  ;;  %v258_v11 = vpop.f32.mrb[15].mxu0  ;;  %v327_v12 = vadd.bf16 1065369472, %v804_v5 }
 0x111   :  { %v306_v13 = vadd.bf16 %v298_v6, %v942_v59  ;;  %v276_v14 = vpack.c.bf16 %v258_v11, %v255_v4  ;;  %v326_v15 = vadd.bf16 1065369472, %v806_v8 }
 0x112   :  { %v315_v16 = vmul.bf16 1061961548, %v307_v9  ;;  %v285_v17 = vmul.bf16 %v277_v10, %v277_v10  ;;  %v335_v18 = vmul.bf16 1056980736, %v327_v12 }
 0x113   :  { %v314_v19 = vmul.bf16 1061961548, %v306_v13  ;;  %v284_v20 = vmul.bf16 %v276_v14, %v276_v14  ;;  %v334_v21 = vmul.bf16 1056980736, %v326_v15 }
 0x114   :  { %v293_v22 = vmul.bf16 %v285_v17, %v277_v10  ;;  %811 = vtanh.bf16 %v315_v16  ;;  %v343_v26 = vmul.bf16 %v335_v18, %v916_v27 }
 0x115   :  { %v292_v23 = vmul.bf16 %v284_v20, %v276_v14  ;;  %v342_v24 = vmul.bf16 %v334_v21, %v918_v29  ;;  %813 = vtanh.bf16 %v314_v19 }
 0x116   :  { %v301_v25 = vmul.bf16 1027030327, %v293_v22 }
 0x117   :  { %v808_v28 = vpop.eup %807  ;;  %v300_v30 = vmul.bf16 1027030327, %v292_v23  ;;  %763 = vmatprep.mubr.bf16.mxu1 %v342_v24 }
 0x118   :  { %v810_v31 = vpop.eup %809  ;;  %v309_v32 = vadd.bf16 %v301_v25, %v277_v10  ;;  %764 = vmatmul.mubr.bf16.vlgmr.msra.gmra.mrb[0].mxu1 %v343_v26  ;;  %v329_v33 = vadd.bf16 1065369472, %v808_v28 }
 0x119   :  { %v308_v34 = vadd.bf16 %v300_v30, %v276_v14  ;;  %v328_v35 = vadd.bf16 1065369472, %v810_v31 }
 0x11a   :  { %v317_v36 = vmul.bf16 1061961548, %v309_v32  ;;  %v337_v37 = vmul.bf16 1056980736, %v329_v33 }
 0x11b   :  { %v316_v38 = vmul.bf16 1061961548, %v308_v34  ;;  %v336_v39 = vmul.bf16 1056980736, %v328_v35 }
 0x11c   :  { %815 = vtanh.bf16 %v317_v36  ;;  %v345_v41 = vmul.bf16 %v337_v37, %v927_v40 }
 0x11d   :  { %v344_v29 = vmul.bf16 %v336_v39, %v929_v42  ;;  %817 = vtanh.bf16 %v316_v38 }
 0x11f   :  { %v812_v27 = vpop.eup %811  ;;  %767 = vmatprep.mubr.bf16.mxu1 %v344_v29 }
 0x120   :  { %v814_v43 = vpop.eup %813  ;;  %768 = vmatmul.mubr.bf16.gmra.mrb[4].mxu1 %v345_v41  ;;  %v331_v44 = vadd.bf16 1065369472, %v812_v27 }
 0x121   :  { %v330_v45 = vadd.bf16 1065369472, %v814_v43 }
 0x122   :  { %v339_v46 = vmul.bf16 1056980736, %v331_v44 }
 0x123   :  { %v338_v47 = vmul.bf16 1056980736, %v330_v45 }
 0x124   :  { %v347_v49 = vmul.bf16 %v339_v46, %v939_v56 }
 0x125   :  { %v346_v48 = vmul.bf16 %v338_v47, %v942_v59 }
 0x127   :  { %v816_v50 = vpop.eup %815  ;;  %771 = vmatprep.mubr.bf16.mxu1 %v346_v48 }
 0x128   :  { %v818_v51 = vpop.eup %817  ;;  %772 = vmatmul.mubr.bf16.gmra.mrb[8].mxu1 %v347_v49  ;;  %v333_v42 = vadd.bf16 1065369472, %v816_v50 }
 0x129   :  { %v332_v52 = vadd.bf16 1065369472, %v818_v51 }
 0x12a   :  { %v341_v53 = vmul.bf16 1056980736, %v333_v42 }
 0x12b   :  { %v340_v40 = vmul.bf16 1056980736, %v332_v52 }
 0x12c   :  { %v349_v55 = vmul.bf16 %v341_v53, %v277_v10 }
 0x12d   :  { %v348_v54 = vmul.bf16 %v340_v40, %v276_v14 }
 0x12f   :  { %775 = vmatprep.mubr.bf16.mxu1 %v348_v54 }
 0x130   :  { %776 = vmatmul.mubr.bf16.gmra.mrb[12].mxu1 %v349_v55 }
 0x1eb   :  { %v765_v57 = vpop.f32.mrb[0].mxu1 }
 0x1ec   :  { %v432_v59 = vpop.f32.mrb[1].mxu1  ;;  %v441_v56 = vadd.f32 %v765_v57, %v579_v58 }
 0x1ed   :  { %v766_v60 = vpop.f32.mrb[2].mxu1  ;;  %v433_v63 = vadd.f32 %v579_v58, %v432_v59 }
 0x1ee   :  { %v444_v61 = vadd.f32 %v766_v60, %v579_v58  ;;  %v435_v62 = vpop.f32.mrb[3].mxu1 }
 0x1ef   :  { %v436_v0 = vadd.f32 %v579_v58, %v435_v62 }
 0x1f0   :  { %v644_v1 = vpack.c.bf16 %v444_v61, %v441_v56 }
 0x1f1   :  { %v639_v2 = vpack.c.bf16 %v436_v0, %v433_v63 }
 0x1f2   :  { %676 = vst [vmem:[%s989_s4 + $0x8] sm:$0xff] %v644_v1  }
 0x1f3   :  { %640 = vst [vmem:[%s989_s4] sm:$0xff] %v639_v2   ;;  %v769_v3 = vpop.f32.mrb[4].mxu1 }
 0x1f4   :  { %v448_v4 = vpop.f32.mrb[5].mxu1  ;;  %v457_v6 = vadd.f32 %v769_v3, %v579_v58 }
 0x1f5   :  { %v770_v5 = vpop.f32.mrb[6].mxu1  ;;  %v449_v9 = vadd.f32 %v579_v58, %v448_v4 }
 0x1f6   :  { %v460_v7 = vadd.f32 %v770_v5, %v579_v58  ;;  %v451_v8 = vpop.f32.mrb[7].mxu1 }
 0x1f7   :  { %v452_v10 = vadd.f32 %v579_v58, %v451_v8 }
 0x1f8   :  { %v654_v11 = vpack.c.bf16 %v460_v7, %v457_v6 }
 0x1f9   :  { %v649_v12 = vpack.c.bf16 %v452_v10, %v449_v9 }
 0x1fa   :  { %678 = vst [vmem:[%s989_s4 + $0x18] sm:$0xff] %v654_v11  }
 0x1fb   :  { %677 = vst [vmem:[%s989_s4 + $0x10] sm:$0xff] %v649_v12   ;;  %v773_v13 = vpop.f32.mrb[8].mxu1 }
 0x1fc   :  { %v464_v14 = vpop.f32.mrb[9].mxu1  ;;  %v473_v16 = vadd.f32 %v773_v13, %v579_v58 }
 0x1fd   :  { %v774_v15 = vpop.f32.mrb[10].mxu1  ;;  %v465_v19 = vadd.f32 %v579_v58, %v464_v14 }
 0x1fe   :  { %v476_v17 = vadd.f32 %v774_v15, %v579_v58  ;;  %v467_v18 = vpop.f32.mrb[11].mxu1 }
 0x1ff   :  { %v468_v20 = vadd.f32 %v579_v58, %v467_v18 }
 0x200   :  { %v664_v21 = vpack.c.bf16 %v476_v17, %v473_v16 }
 0x201   :  { %v659_v22 = vpack.c.bf16 %v468_v20, %v465_v19 }
 0x202   :  { %680 = vst [vmem:[%s989_s4 + $0x28] sm:$0xff] %v664_v21  }
 0x203   :  { %679 = vst [vmem:[%s989_s4 + $0x20] sm:$0xff] %v659_v22   ;;  %v777_v23 = vpop.f32.mrb[12].mxu1 }
 0x204   :  { %v480_v24 = vpop.f32.mrb[13].mxu1  ;;  %v489_v26 = vadd.f32 %v777_v23, %v579_v58 }
 0x205   :  { %v778_v25 = vpop.f32.mrb[14].mxu1  ;;  %v481_v31 = vadd.f32 %v579_v58, %v480_v24 }
 0x206   :  { %v492_v28 = vadd.f32 %v778_v25, %v579_v58  ;;  %v483_v30 = vpop.f32.mrb[15].mxu1 }
 0x207   :  { %v484_v32 = vadd.f32 %v579_v58, %v483_v30 }
 0x208   :  { %v674_v33 = vpack.c.bf16 %v492_v28, %v489_v26 }
 0x209   :  { %v669_v34 = vpack.c.bf16 %v484_v32, %v481_v31 }
 0x20a   :  { %682 = vst [vmem:[%s989_s4 + $0x38] sm:$0xff] %v674_v33  }
 0x20b   :  { %681 = vst [vmem:[%s989_s4 + $0x30] sm:$0xff] %v669_v34  }

</bundles_post_ra>
